<compile_context>
chip_gen: v5e
topology: v5e:2x2
jax: 0.10.0
libtpu: 0.0.40
codegen_flags: <defaults>
</compile_context>

<pallas_src>
import jax
import jax.numpy as jnp
from jax.experimental import pallas as pl
from jax.experimental.pallas import tpu as pltpu


# --------------------- Kernel 1: fused QKV projection -----------------------

def _qkv_proj_kernel(x_ref, wq_ref, wk_ref, wv_ref, q_ref, k_ref, v_ref):
    """One row tile of the Q/K/V projections.

    x_ref : (tb, C)      input rows
    wq_ref: (C, H*hs)    packed query weights (softmax scale pre-folded)
    wk_ref: (C, H*hs)    packed key weights
    wv_ref: (C, H*hs)    packed value weights
    q/k/v : (tb, H*hs)   outputs
    """
    x = x_ref[...]
    q_ref[...] = jnp.dot(x, wq_ref[...],
                         preferred_element_type=jnp.float32).astype(q_ref.dtype)
    k_ref[...] = jnp.dot(x, wk_ref[...],
                         preferred_element_type=jnp.float32).astype(k_ref.dtype)
    v_ref[...] = jnp.dot(x, wv_ref[...],
                         preferred_element_type=jnp.float32).astype(v_ref.dtype)


# ------------- Kernel 2: flash attention + output projection ----------------

def _attn_proj_kernel(q_ref, k_ref, v_ref, wp_ref, bp_ref, o_ref,
                      m_ref, l_ref, acc_ref):
    """Flash-style attention over key tiles + fused output projection.

    q_ref : (H, tq, hs)   query tile (head-major, scale folded into weights)
    k_ref : (H, tk, hs)   key tile
    v_ref : (H, tk, hs)   value tile
    wp_ref: (H, hs, C)    output projection weight, split per head
    bp_ref: (1, C)        output projection bias
    o_ref : (tq, C)       output rows for this query tile
    m/l   : (H, tq, 1)    running max / running softmax denominator (f32)
    acc   : (H, tq, hs)   running P@V accumulator (f32)
    """
    kv = pl.program_id(1)

    @pl.when(kv == 0)
    def _():
        m_ref[...] = jnp.full_like(m_ref, -jnp.inf)
        l_ref[...] = jnp.zeros_like(l_ref)
        acc_ref[...] = jnp.zeros_like(acc_ref)

    # Scores for all heads in ONE leading-batch MXU contraction: (H, tq, tk).
    # (1/sqrt(hs) already folded into w_q wrapper-side -> no VPU scale here.)
    s = jnp.einsum('hqd,hkd->hqk', q_ref[...], k_ref[...],
                   preferred_element_type=jnp.float32)

    m_prev = m_ref[...]
    m_new = jnp.maximum(m_prev, s.max(axis=-1, keepdims=True))   # (H, tq, 1)
    alpha = jnp.exp(m_prev - m_new)
    p = jnp.exp(s - m_new)                                       # (H, tq, tk)
    # dropout on attention weights: eval-mode identity
    # TODO(synk): training-mode nn.Dropout(p=0.2) would need a pltpu.prng_* path.

    l_ref[...] = alpha * l_ref[...] + p.sum(axis=-1, keepdims=True)
    acc_ref[...] = alpha * acc_ref[...] + jnp.einsum(
        'hqk,hkd->hqd', p.astype(v_ref.dtype), v_ref[...],
        preferred_element_type=jnp.float32)                      # (H, tq, hs)
    m_ref[...] = m_new

    @pl.when(kv == pl.num_programs(1) - 1)
    def _():
        # Normalize once, after all P@V accumulation (exact reciprocal).
        att = acc_ref[...] / l_ref[...]                          # (H, tq, hs)
        # Output projection, head-batched then reduced over heads (no
        # in-kernel transpose/reshape needed).
        parts = jnp.einsum('hqd,hdc->hqc',
                           att.astype(wp_ref.dtype), wp_ref[...],
                           preferred_element_type=jnp.float32)   # (H, tq, C)
        out = parts.sum(axis=0) + bp_ref[...]                    # (tq, C)
        # dropout on projection output: eval-mode identity
        o_ref[...] = out.astype(o_ref.dtype)


# ------------------------------ JAX wrapper --------------------------------

def multi_head_attention(x, wk, wq, wv, w_proj, b_proj, *,
                         block_rows=256, block_q=256, block_k=256,
                         param_dtype=None):
    """
    x       : (B, C)        activations
    wk/wq/wv: (H, C, hs)    per-head weights (already laid out as in @ w -> out)
    w_proj  : (H*hs, C)     projection weight (transposed)
    b_proj  : (C,)          projection bias
    param_dtype: optional MXU operand dtype (e.g. jnp.bfloat16 on v6e/v7x);
                 softmax math and accumulation stay f32 regardless.
    returns : (B, C)
    """
    B, C = x.shape
    H, _, hs = wq.shape
    Hh = H * hs

    cdt = param_dtype if param_dtype is not None else x.dtype
    x = x.astype(cdt)

    # Pack per-head weights into wide lane-dense matrices (trace-time, one-off).
    # Column block h*hs:(h+1)*hs of w_q equals wq[h], matching torch.cat order.
    scale = hs ** (-0.5)
    w_q = (jnp.transpose(wq, (1, 0, 2)).reshape(C, Hh) * scale).astype(cdt)
    w_k = jnp.transpose(wk, (1, 0, 2)).reshape(C, Hh).astype(cdt)
    w_v = jnp.transpose(wv, (1, 0, 2)).reshape(C, Hh).astype(cdt)

    # ---- pass 1: Q/K/V projections, computed once over all rows ----
    tb = min(B, block_rows)
    assert B % tb == 0, "row tile must divide B"

    q2, k2, v2 = pl.pallas_call(
        _qkv_proj_kernel,
        out_shape=(jax.ShapeDtypeStruct((B, Hh), cdt),
                   jax.ShapeDtypeStruct((B, Hh), cdt),
                   jax.ShapeDtypeStruct((B, Hh), cdt)),
        grid=(B // tb,),
        in_specs=[
            pl.BlockSpec((tb, C), lambda i: (i, 0)),      # x rows
            pl.BlockSpec((C, Hh), lambda i: (0, 0)),      # w_q (scaled)
            pl.BlockSpec((C, Hh), lambda i: (0, 0)),      # w_k
            pl.BlockSpec((C, Hh), lambda i: (0, 0)),      # w_v
        ],
        out_specs=(
            pl.BlockSpec((tb, Hh), lambda i: (i, 0)),
            pl.BlockSpec((tb, Hh), lambda i: (i, 0)),
            pl.BlockSpec((tb, Hh), lambda i: (i, 0)),
        ),
        compiler_params=pltpu.CompilerParams(
            dimension_semantics=("parallel",)),
    )(x, w_q, w_k, w_v)

    # One-off head-major relayout (plain XLA) so the attention kernel needs no
    # in-kernel transposes: (B, H*hs) -> (H, B, hs).
    qh = jnp.transpose(q2.reshape(B, H, hs), (1, 0, 2))
    kh = jnp.transpose(k2.reshape(B, H, hs), (1, 0, 2))
    vh = jnp.transpose(v2.reshape(B, H, hs), (1, 0, 2))

    wp3 = w_proj.astype(cdt).reshape(H, hs, C)
    bp2 = b_proj.astype(jnp.float32).reshape(1, C)

    # ---- pass 2: flash attention over key tiles + fused output projection ----
    tq = min(B, block_q)
    tk = min(B, block_k)
    assert B % tq == 0 and B % tk == 0, "query/key tiles must divide B"

    out = pl.pallas_call(
        _attn_proj_kernel,
        out_shape=jax.ShapeDtypeStruct((B, C), x.dtype),
        grid=(B // tq, B // tk),
        in_specs=[
            pl.BlockSpec((H, tq, hs), lambda i, j: (0, i, 0)),   # Q tile
            pl.BlockSpec((H, tk, hs), lambda i, j: (0, j, 0)),   # K tile
            pl.BlockSpec((H, tk, hs), lambda i, j: (0, j, 0)),   # V tile
            pl.BlockSpec((H, hs, C), lambda i, j: (0, 0, 0)),    # w_proj
            pl.BlockSpec((1, C), lambda i, j: (0, 0)),           # b_proj
        ],
        out_specs=pl.BlockSpec((tq, C), lambda i, j: (i, 0)),
        scratch_shapes=[
            pltpu.VMEM((H, tq, 1), jnp.float32),   # running max
            pltpu.VMEM((H, tq, 1), jnp.float32),   # running denom
            pltpu.VMEM((H, tq, hs), jnp.float32),  # running P@V accumulator
        ],
        compiler_params=pltpu.CompilerParams(
            dimension_semantics=("parallel", "arbitrary")),
    )(qh, kh, vh, wp3, bp2)

    return out


# ------------------------------- reference ---------------------------------

def reference(x, wk, wq, wv, w_proj, b_proj):
    H, C, hs = wk.shape
    outs = []
    for h in range(H):
        k = x @ wk[h]
        q = x @ wq[h]
        v = x @ wv[h]
        wei = q @ k.T * (hs ** -0.5)
        wei = jax.nn.softmax(wei, axis=-1)
        outs.append(wei @ v)
    cat = jnp.concatenate(outs, axis=-1)
    return cat @ w_proj + b_proj


# --------------------------------- main -------------------------------------

if __name__ == "__main__":
    B = 8           # number of rows (attention is over this axis)
    n_embd = 32
    num_heads = 4
    head_size = 8

    key = jax.random.PRNGKey(0)
    kx, kk, kq, kv, kw, kb = jax.random.split(key, 6)

    # deterministic parameter init (PyTorch-style uniform(-1/sqrt(fan_in), ...))
    lim_h = 1.0 / (n_embd ** 0.5)
    wk = jax.random.uniform(kk, (num_heads, n_embd, head_size), jnp.float32, -lim_h, lim_h)
    wq = jax.random.uniform(kq, (num_heads, n_embd, head_size), jnp.float32, -lim_h, lim_h)
    wv = jax.random.uniform(kv, (num_heads, n_embd, head_size), jnp.float32, -lim_h, lim_h)

    lim_p = 1.0 / ((num_heads * head_size) ** 0.5)
    w_proj = jax.random.uniform(kw, (num_heads * head_size, n_embd), jnp.float32, -lim_p, lim_p)
    b_proj = jax.random.uniform(kb, (n_embd,), jnp.float32, -lim_p, lim_p)

    x = jax.random.normal(kx, (B, n_embd), jnp.float32)

    out = multi_head_attention(x, wk, wq, wv, w_proj, b_proj)
    out = jax.block_until_ready(out)

    ref = reference(x, wk, wq, wv, w_proj, b_proj)
    assert out.shape == (B, n_embd)
    assert jnp.allclose(out, ref, atol=1e-4, rtol=1e-4), "mismatch vs reference"

    print("KERNEL_OK")
</pallas_src>

<mosaic_0001>
module attributes {stable_mosaic.version = 11 : i64} {
  func.func @_qkv_proj_kernel(%arg0: i32, %arg1: memref<8x32xf32, #tpu.memory_space<vmem>>, %arg2: memref<32x32xf32, #tpu.memory_space<vmem>>, %arg3: memref<32x32xf32, #tpu.memory_space<vmem>>, %arg4: memref<32x32xf32, #tpu.memory_space<vmem>>, %arg5: memref<8x32xf32, #tpu.memory_space<vmem>>, %arg6: memref<8x32xf32, #tpu.memory_space<vmem>>, %arg7: memref<8x32xf32, #tpu.memory_space<vmem>>) attributes {dimension_semantics = [#tpu.dimension_semantics<parallel>], iteration_bounds = array<i64: 1>, scalar_prefetch = 0 : i64, scratch_operands = 0 : i64, tpu.core_type = #tpu.core_type<tc>, window_params = [{transform_indices = @transform_0, window_bounds = array<i64: 8, 32>}, {pipeline_mode = #tpu.pipeline_mode<synchronous>, transform_indices = @transform_1, window_bounds = array<i64: 32, 32>}, {pipeline_mode = #tpu.pipeline_mode<synchronous>, transform_indices = @transform_2, window_bounds = array<i64: 32, 32>}, {pipeline_mode = #tpu.pipeline_mode<synchronous>, transform_indices = @transform_3, window_bounds = array<i64: 32, 32>}, {transform_indices = @transform_4, window_bounds = array<i64: 8, 32>}, {transform_indices = @transform_5, window_bounds = array<i64: 8, 32>}, {transform_indices = @transform_6, window_bounds = array<i64: 8, 32>}]} {
    %c0 = arith.constant 0 : index
    %c0_0 = arith.constant 0 : index
    %0 = vector.load %arg1[%c0, %c0_0] : memref<8x32xf32, #tpu.memory_space<vmem>>, vector<8x32xf32>
    %c0_1 = arith.constant 0 : index
    %c0_2 = arith.constant 0 : index
    %1 = vector.load %arg2[%c0_1, %c0_2] : memref<32x32xf32, #tpu.memory_space<vmem>>, vector<32x32xf32>
    %cst = arith.constant dense<0.000000e+00> : vector<8x32xf32>
    %2 = tpu.matmul %0, %1, %cst {dimension_numbers = #tpu.dot_dimension_numbers<[1], [0], [0], [1], [0, 0, 1, 1], [], []>} : vector<8x32xf32>, vector<32x32xf32>, vector<8x32xf32> -> vector<8x32xf32>
    %c0_3 = arith.constant 0 : index
    %c0_4 = arith.constant 0 : index
    %3 = vector.load %arg5[%c0_3, %c0_4] : memref<8x32xf32, #tpu.memory_space<vmem>>, vector<8x32xf32>
    tpu.vector_store %arg5[%c0_3, %c0_4], %2 {strides = array<i32>} : memref<8x32xf32, #tpu.memory_space<vmem>>, vector<8x32xf32>,
    %c0_5 = arith.constant 0 : index
    %c0_6 = arith.constant 0 : index
    %4 = vector.load %arg3[%c0_5, %c0_6] : memref<32x32xf32, #tpu.memory_space<vmem>>, vector<32x32xf32>
    %cst_7 = arith.constant dense<0.000000e+00> : vector<8x32xf32>
    %5 = tpu.matmul %0, %4, %cst_7 {dimension_numbers = #tpu.dot_dimension_numbers<[1], [0], [0], [1], [0, 0, 1, 1], [], []>} : vector<8x32xf32>, vector<32x32xf32>, vector<8x32xf32> -> vector<8x32xf32>
    %c0_8 = arith.constant 0 : index
    %c0_9 = arith.constant 0 : index
    %6 = vector.load %arg6[%c0_8, %c0_9] : memref<8x32xf32, #tpu.memory_space<vmem>>, vector<8x32xf32>
    tpu.vector_store %arg6[%c0_8, %c0_9], %5 {strides = array<i32>} : memref<8x32xf32, #tpu.memory_space<vmem>>, vector<8x32xf32>,
    %c0_10 = arith.constant 0 : index
    %c0_11 = arith.constant 0 : index
    %7 = vector.load %arg4[%c0_10, %c0_11] : memref<32x32xf32, #tpu.memory_space<vmem>>, vector<32x32xf32>
    %cst_12 = arith.constant dense<0.000000e+00> : vector<8x32xf32>
    %8 = tpu.matmul %0, %7, %cst_12 {dimension_numbers = #tpu.dot_dimension_numbers<[1], [0], [0], [1], [0, 0, 1, 1], [], []>} : vector<8x32xf32>, vector<32x32xf32>, vector<8x32xf32> -> vector<8x32xf32>
    %c0_13 = arith.constant 0 : index
    %c0_14 = arith.constant 0 : index
    %9 = vector.load %arg7[%c0_13, %c0_14] : memref<8x32xf32, #tpu.memory_space<vmem>>, vector<8x32xf32>
    tpu.vector_store %arg7[%c0_13, %c0_14], %8 {strides = array<i32>} : memref<8x32xf32, #tpu.memory_space<vmem>>, vector<8x32xf32>,
    return
  }
  func.func @transform_0(%arg0: i32) -> (i32, i32) {
    %c0_i32 = arith.constant 0 : i32
    %c0_i32_0 = arith.constant 0 : i32
    return %arg0, %c0_i32 : i32, i32
  }
  func.func @transform_1(%arg0: i32) -> (i32, i32) {
    %c0_i32 = arith.constant 0 : i32
    %c0_i32_0 = arith.constant 0 : i32
    %c0_i32_1 = arith.constant 0 : i32
    return %c0_i32, %c0_i32_0 : i32, i32
  }
  func.func @transform_2(%arg0: i32) -> (i32, i32) {
    %c0_i32 = arith.constant 0 : i32
    %c0_i32_0 = arith.constant 0 : i32
    %c0_i32_1 = arith.constant 0 : i32
    return %c0_i32, %c0_i32_0 : i32, i32
  }
  func.func @transform_3(%arg0: i32) -> (i32, i32) {
    %c0_i32 = arith.constant 0 : i32
    %c0_i32_0 = arith.constant 0 : i32
    %c0_i32_1 = arith.constant 0 : i32
    return %c0_i32, %c0_i32_0 : i32, i32
  }
  func.func @transform_4(%arg0: i32) -> (i32, i32) {
    %c0_i32 = arith.constant 0 : i32
    %c0_i32_0 = arith.constant 0 : i32
    return %arg0, %c0_i32 : i32, i32
  }
  func.func @transform_5(%arg0: i32) -> (i32, i32) {
    %c0_i32 = arith.constant 0 : i32
    %c0_i32_0 = arith.constant 0 : i32
    return %arg0, %c0_i32 : i32, i32
  }
  func.func @transform_6(%arg0: i32) -> (i32, i32) {
    %c0_i32 = arith.constant 0 : i32
    %c0_i32_0 = arith.constant 0 : i32
    return %arg0, %c0_i32 : i32, i32
  }
}

</mosaic_0001>

<bundles_post_ra>
// kernel: tpu_custom_call.1
= control target key start
LH: loop header
LB: loop body
LE: loop exit
PB: predicated region body
PF: predicated region fallthrough
CT: control target
= control target key end

     0   :  { %12 = vsyncpa [#allocation3], 0  ;;  %s474_s0 = inlined_call_operand.hbm [shape: f32[8,32], index: 0, kind: input, shape index: {}]   ;;  %s475_s1 = inlined_call_operand.hbm [shape: f32[32,32], index: 1, kind: input, shape index: {}]   ;;  %s476_s2 = inlined_call_operand.hbm [shape: f32[32,32], index: 2, kind: input, shape index: {}]   ;;  %s477_s3 = inlined_call_operand.hbm [shape: f32[32,32], index: 3, kind: input, shape index: {}]   ;;  %s478_s4 = inlined_call_operand.hbm [shape: f32[8,32], index: 4, kind: output, shape index: {0}]   ;;  %s479_s5 = inlined_call_operand.hbm [shape: f32[8,32], index: 5, kind: output, shape index: {1}]   ;;  %s480_s6 = inlined_call_operand.hbm [shape: f32[8,32], index: 6, kind: output, shape index: {2}]  }
   0x1   :  { %13 = vsyncpa [#allocation6], 0 }
   0x2   :  { %14 = vsyncpa [#allocation9], 0 }
   0x3   :  { %15 = vsyncpa [#allocation4], 0  ;;  %s32_s23 = sshll.u32 %s475_s1, 4  ;;  %s33_s23 = int_to_ptr.hbm [resolvable:$true] %s32_s23 }
   0x4   :  { %16 = vsyncpa [#allocation12], 0  ;;  %s403_s24 = smov [#allocation5]   ;;  %s22_s28 = sshll.u32 %s474_s0, 4  ;;  %s23_s28 = int_to_ptr.hbm [resolvable:$true] %s22_s28 }
   0x5   :  { %s34_s25 = sshll.u32 %s403_s24, 4  ;;  %s404_s29 = smov 128   ;;  %s35_s25 = int_to_ptr.vmem [resolvable:$true] %s34_s25 }
   0x6   :  { %s405_s30 = smov 8   ;;  %s406_s7 = smov [#allocation2]  }
   0x7   :  { %40 = dma.hbm_to_vmem [thread:$0]  %s33_s23, 512, %s35_s25, [#allocation6], %s404_s29, %s404_s29, %s405_s30  }
   0x8   :  { %s24_s8 = sshll.u32 %s406_s7, 4  ;;  %s45_s11 = sshll.u32 %s476_s2, 4  ;;  %s25_s8 = int_to_ptr.vmem [resolvable:$true] %s24_s8  ;;  %s46_s11 = int_to_ptr.hbm [resolvable:$true] %s45_s11 }
   0x9   :  { %27 = dma.hbm_to_vmem [thread:$0]  %s23_s28, 128, %s25_s8, [#allocation3]  }
   0xa   :  { %s58_s13 = sshll.u32 %s477_s3, 4  ;;  %s407_s14 = smov [#allocation7]   ;;  %s59_s13 = int_to_ptr.hbm [resolvable:$true] %s58_s13 }
   0xb   :  { %s47_s15 = sshll.u32 %s407_s14, 4  ;;  %s408_s0 = smov [#allocation8]   ;;  %s48_s15 = int_to_ptr.vmem [resolvable:$true] %s47_s15 }
   0xc   :  { %53 = dma.hbm_to_vmem [thread:$0]  %s46_s11, 512, %s48_s15, [#allocation6], %s404_s29, %s404_s29, %s405_s30  }
   0xd   :  { %s60_s16 = sshll.u32 %s408_s0, 4  ;;  %s61_s16 = int_to_ptr.vmem [resolvable:$true] %s60_s16 }
   0xe   :  { %66 = dma.hbm_to_vmem [thread:$0]  %s59_s13, 512, %s61_s16, [#allocation9], %s404_s29, %s404_s29, %s405_s30  }
   0xf   :  { %393 = dma.done.wait [#allocation3], 128  }
  0x10   :  { %394 = vsyncadd [#allocation3], 4294967168 }
  0x11   :  { %395 = dma.done.wait [#allocation6], 1024  }
  0x12   :  { %396 = vsyncadd [#allocation6], 4294966272 }
  0x13   :  { %397 = dma.done.wait [#allocation9], 512  }
  0x14   :  { %398 = vsyncadd [#allocation9], 4294966784  ;;  %v141_v0 = vld [vmem:[#allocation8 + $0x18] sm:$0xff]  ;;  %v140_v1 = vld [vmem:[#allocation8 + $0x10] sm:$0xff]  ;;  %vm88_vm0 = vcmask 261120   ;;  %s409_s2 = smov [#allocation11]  }
  0x15   :  { %154 = vmatpush.msra.mxu2 %v141_v0  ;;  %v116_v2 = vld [vmem:[#allocation7 + $0x18] sm:$0xff]  ;;  %v139_v4 = vld [vmem:[#allocation8 + $0x8] sm:$0xff]  ;;  %v115_v5 = vld [vmem:[#allocation7 + $0x10] sm:$0xff]  ;;  %s179_s3 = sshll.u32 %s409_s2, 4  ;;  %s181_s19 = sshll.u32 %s479_s5, 4  ;;  %s180_s3 = int_to_ptr.vmem [resolvable:$true] %s179_s3  ;;  %s182_s19 = int_to_ptr.hbm [resolvable:$true] %s181_s19 }
  0x16   :  { %v87_v3 = vld [vmem:[#allocation5 + $0x18] sm:$0xff]  ;;  %129 = vmatpush.msra.mxu1 %v116_v2  ;;  %v86_v6 = vld [vmem:[#allocation5 + $0x10] sm:$0xff]  ;;  %v114_v7 = vld [vmem:[#allocation7 + $0x8] sm:$0xff]  ;;  %s410_s20 = smov [#allocation10]   ;;  %s170_s24 = sshll.u32 %s478_s4, 4  ;;  %s171_s24 = int_to_ptr.hbm [resolvable:$true] %s170_s24 }
  0x17   :  { %104 = vmatpush.msra.mxu0 %v87_v3  ;;  %155 = vmatpush.msra.mxu2 %v140_v1  ;;  %v85_v8 = vld [vmem:[#allocation5 + $0x8] sm:$0xff]  ;;  %v138_v9 = vld [vmem:[#allocation8] sm:$0xff]  ;;  %v83_v10 = vld [vmem:[#allocation2] sm:$0xff]  ;;  %s168_s21 = sshll.u32 %s410_s20, 4  ;;  %s411_s25 = smov [#allocation13]   ;;  %s169_s21 = int_to_ptr.vmem [resolvable:$true] %s168_s21 }
  0x18   :  { %130 = vmatpush.msra.mxu1 %v115_v5  ;;  %v113_v11 = vld [vmem:[#allocation7] sm:$0xff]  ;;  %s190_s26 = sshll.u32 %s411_s25, 4  ;;  %s192_s5 = sshll.u32 %s480_s6, 4  ;;  %s191_s26 = int_to_ptr.vmem [resolvable:$true] %s190_s26  ;;  %s193_s5 = int_to_ptr.hbm [resolvable:$true] %s192_s5 }
  0x19   :  { %105 = vmatpush.msra.mxu0 %v86_v6  ;;  %156 = vmatpush.msra.mxu2 %v139_v4  ;;  %v84_v12 = vld [vmem:[#allocation5] sm:$0xff] }
  0x1a   :  { %131 = vmatpush.msra.mxu1 %v114_v7 }
  0x1b   :  { %106 = vmatpush.msra.mxu0 %v85_v8  ;;  %157 = vmatpush.msra.mxu2 %v138_v9 }
  0x1c   :  { %215 = vmatmul.msk.f32.vlgmr.msra.gmra.mxu2 %vm88_vm0, %v83_v10  ;;  %132 = vmatpush.msra.mxu1 %v113_v11 }
  0x1d   :  { %107 = vmatpush.msra.mxu0 %v84_v12  ;;  %214 = vmatmul.msk.f32.vlgmr.msra.gmra.mxu1 %vm88_vm0, %v83_v10 }
  0x1e   :  { %213 = vmatmul.msk.f32.vlgmr.msra.gmra.mxu0 %vm88_vm0, %v83_v10 }
  0x9a   :  { %v134_v13 = vpop.f32.mrf.mxu1 }
  0x9b   :  { %137 = vst.msk [vmem:[#allocation11] sm:$0xff] %vm88_vm0, %v134_v13  ;;  %v109_v14 = vpop.f32.mrf.mxu0 }
  0x9c   :  { %112 = vst.msk [vmem:[#allocation10] sm:$0xff] %vm88_vm0, %v109_v14  ;;  %184 = dma.vmem_to_hbm [thread:$0]  %s180_s3, 128, %s182_s19, [#allocation12]  }
  0x9d   :  { %173 = dma.vmem_to_hbm [thread:$0]  %s169_s21, 128, %s171_s24, [#allocation4]  }
  0x9f   :  { %v159_v15 = vpop.f32.mrf.mxu2 }
  0xa0   :  { %162 = vst.msk [vmem:[#allocation13] sm:$0xff] %vm88_vm0, %v159_v15 }
  0xa1   :  { %195 = dma.vmem_to_hbm [thread:$0]  %s191_s26, 128, %s193_s5, [#allocation12]  }
  0xa2   :  { %399 = dma.done.wait [#allocation4], 128  }
  0xa3   :  { %400 = vsyncadd [#allocation4], 4294967168 }
  0xa4   :  { %401 = dma.done.wait [#allocation12], 256  }
  0xa5   :  { %402 = vsyncadd [#allocation12], 4294967040 }
  0xa6   :  { %208 = vsyncpa [#allocation3], 1 }
  0xa7   :  { %209 = vsyncpa [#allocation6], 1 }
  0xa8   :  { %210 = vsyncpa [#allocation9], 1 }
  0xa9   :  { %211 = vsyncpa [#allocation4], 1 }
  0xaa   :  { %212 = vsyncpa [#allocation12], 1 }

</bundles_post_ra>
